<compile_context>
chip_gen: v5e
topology: v5e:2x2
jax: 0.10.0
libtpu: 0.0.40
codegen_flags: <defaults>
</compile_context>

<pallas_src>
import math

import jax
import jax.numpy as jnp
from jax.experimental import pallas as pl
from jax.experimental.pallas import tpu as pltpu  # noqa: F401  (TPU backend)

_LANE = 128


def _linear_bias_kernel(x_ref, w_ref, b_ref, o_ref):
    # x_ref: (M, C) activations, w_ref: (C, Npad) weights, b_ref: (1, Npad) bias.
    # Single MXU matmul with f32 accumulation + VPU bias add, lane-dense store.
    o_ref[...] = (
        jnp.dot(x_ref[...], w_ref[...], preferred_element_type=jnp.float32)
        + b_ref[...]
    ).astype(o_ref.dtype)


def classification_output_adapter_forward(x, weight, bias, num_classes=None):
    """Pallas equivalent of ClassificationOutputAdapter.forward().

    Args:
      x:       (B, Q, C) decoder cross-attention output.
      weight:  (C, N) linear weight (may already be padded along N to a
               multiple of 128; padded columns must be zero).
      bias:    (N,) linear bias (same padding convention as `weight`).
      num_classes: true number of classes (defaults to weight.shape[1]).
    Returns:
      (B, num_classes) if Q == 1 else (B, Q, num_classes), dtype of `x`.
    """
    B, Q, C = x.shape
    n_padded = weight.shape[1]
    N = num_classes if num_classes is not None else n_padded

    # Pad the class dim to a lane-dense multiple of 128 if the caller did not.
    lane_n = max(_LANE, ((n_padded + _LANE - 1) // _LANE) * _LANE)
    if lane_n != n_padded:
        weight = jnp.pad(weight, ((0, 0), (0, lane_n - n_padded)))
        bias = jnp.pad(bias, ((0, lane_n - n_padded),))

    M = B * Q
    x2 = x.reshape(M, C)            # metadata-only reshape
    b2 = bias.reshape(1, lane_n)    # 2-D so the bias block is (1, lane_n)

    out = pl.pallas_call(
        _linear_bias_kernel,
        out_shape=jax.ShapeDtypeStruct((M, lane_n), x.dtype),
        grid=(1,),
        in_specs=[
            pl.BlockSpec((M, C), lambda i: (0, 0)),        # full-array block
            pl.BlockSpec((C, lane_n), lambda i: (0, 0)),   # (C, 128k): aligned
            pl.BlockSpec((1, lane_n), lambda i: (0, 0)),   # full-array block
        ],
        out_specs=pl.BlockSpec((M, lane_n), lambda i: (0, 0)),
    )(x2, weight, b2)

    out = out[:, :N].reshape(B, Q, N)
    if Q == 1:                       # torch squeeze(dim=1) semantics
        out = out.reshape(B, N)
    return out


class ClassificationOutputAdapterJAX:
    """Mirror of the PyTorch module: Linear(C -> num_classes) + squeeze(dim=1).

    The weight/bias are stored pre-padded along the class dimension to a
    multiple of 128 (zeros in the padded columns) so the kernel's output is
    lane-dense with zero per-forward padding cost.
    """

    def __init__(self, num_classes: int, num_output_query_channels: int, *, key):
        k_w, k_b = jax.random.split(key)
        bound = 1.0 / math.sqrt(num_output_query_channels)
        # Stored as (C, N) so the kernel needs no transpose (x @ W + b).
        w = jax.random.uniform(
            k_w, (num_output_query_channels, num_classes),
            minval=-bound, maxval=bound, dtype=jnp.float32)
        b = jax.random.uniform(
            k_b, (num_classes,), minval=-bound, maxval=bound, dtype=jnp.float32)

        self.num_classes = num_classes
        n_pad = max(_LANE, ((num_classes + _LANE - 1) // _LANE) * _LANE)
        self.weight = jnp.pad(w, ((0, 0), (0, n_pad - num_classes)))
        self.bias = jnp.pad(b, ((0, n_pad - num_classes),))

    def __call__(self, x):
        return classification_output_adapter_forward(
            x, self.weight, self.bias, self.num_classes)


if __name__ == "__main__":
    key = jax.random.PRNGKey(0)
    k_param, k_x = jax.random.split(key)

    batch = 2
    num_queries = 1                 # classification decoder uses a single query
    num_output_query_channels = 32
    num_classes = 10

    adapter = ClassificationOutputAdapterJAX(
        num_classes, num_output_query_channels, key=k_param)

    x = jax.random.normal(
        k_x, (batch, num_queries, num_output_query_channels), dtype=jnp.float32)

    out = adapter(x)
    out = jax.block_until_ready(out)

    # Reference: plain XLA linear + squeeze on the unpadded params.
    w_true = adapter.weight[:, :num_classes]
    b_true = adapter.bias[:num_classes]
    expected = jnp.einsum("bqc,cn->bqn", x, w_true) + b_true
    expected = expected[:, 0, :]    # squeeze(dim=1), Q == 1

    assert out.shape == (batch, num_classes), out.shape
    assert out.dtype == x.dtype
    assert jnp.allclose(out, expected, rtol=1e-4, atol=1e-4), (
        float(jnp.max(jnp.abs(out - expected))))

    print("KERNEL_OK")
</pallas_src>

<mosaic_0001>
module attributes {stable_mosaic.version = 11 : i64} {
  func.func @_linear_bias_kernel(%arg0: i32, %arg1: memref<2x32xf32, #tpu.memory_space<vmem>>, %arg2: memref<32x128xf32, #tpu.memory_space<vmem>>, %arg3: memref<1x128xf32, #tpu.memory_space<vmem>>, %arg4: memref<2x128xf32, #tpu.memory_space<vmem>>) attributes {dimension_semantics = [#tpu.dimension_semantics<arbitrary>], iteration_bounds = array<i64: 1>, scalar_prefetch = 0 : i64, scratch_operands = 0 : i64, tpu.core_type = #tpu.core_type<tc>, window_params = [{pipeline_mode = #tpu.pipeline_mode<synchronous>, transform_indices = @transform_0, window_bounds = array<i64: 2, 32>}, {pipeline_mode = #tpu.pipeline_mode<synchronous>, transform_indices = @transform_1, window_bounds = array<i64: 32, 128>}, {pipeline_mode = #tpu.pipeline_mode<synchronous>, transform_indices = @transform_2, window_bounds = array<i64: 1, 128>}, {pipeline_mode = #tpu.pipeline_mode<synchronous>, transform_indices = @transform_3, window_bounds = array<i64: 2, 128>}]} {
    %c0 = arith.constant 0 : index
    %c0_0 = arith.constant 0 : index
    %0 = vector.load %arg1[%c0, %c0_0] : memref<2x32xf32, #tpu.memory_space<vmem>>, vector<2x32xf32>
    %c0_1 = arith.constant 0 : index
    %c0_2 = arith.constant 0 : index
    %1 = vector.load %arg2[%c0_1, %c0_2] : memref<32x128xf32, #tpu.memory_space<vmem>>, vector<32x128xf32>
    %cst = arith.constant dense<0.000000e+00> : vector<2x128xf32>
    %2 = tpu.matmul %0, %1, %cst {dimension_numbers = #tpu.dot_dimension_numbers<[1], [0], [0], [1], [0, 0, 1, 1], [], []>} : vector<2x32xf32>, vector<32x128xf32>, vector<2x128xf32> -> vector<2x128xf32>
    %c0_3 = arith.constant 0 : index
    %c0_4 = arith.constant 0 : index
    %3 = vector.load %arg3[%c0_3, %c0_4] : memref<1x128xf32, #tpu.memory_space<vmem>>, vector<1x128xf32>
    %4 = vector.broadcast %3 : vector<1x128xf32> to vector<2x128xf32>
    %5 = arith.addf %2, %4 : vector<2x128xf32>
    %c0_5 = arith.constant 0 : index
    %c0_6 = arith.constant 0 : index
    %6 = vector.load %arg4[%c0_5, %c0_6] : memref<2x128xf32, #tpu.memory_space<vmem>>, vector<2x128xf32>
    tpu.vector_store %arg4[%c0_5, %c0_6], %5 {strides = array<i32>} : memref<2x128xf32, #tpu.memory_space<vmem>>, vector<2x128xf32>,
    return
  }
  func.func @transform_0(%arg0: i32) -> (i32, i32) {
    %c0_i32 = arith.constant 0 : i32
    %c0_i32_0 = arith.constant 0 : i32
    %c0_i32_1 = arith.constant 0 : i32
    return %c0_i32, %c0_i32_0 : i32, i32
  }
  func.func @transform_1(%arg0: i32) -> (i32, i32) {
    %c0_i32 = arith.constant 0 : i32
    %c0_i32_0 = arith.constant 0 : i32
    %c0_i32_1 = arith.constant 0 : i32
    return %c0_i32, %c0_i32_0 : i32, i32
  }
  func.func @transform_2(%arg0: i32) -> (i32, i32) {
    %c0_i32 = arith.constant 0 : i32
    %c0_i32_0 = arith.constant 0 : i32
    %c0_i32_1 = arith.constant 0 : i32
    return %c0_i32, %c0_i32_0 : i32, i32
  }
  func.func @transform_3(%arg0: i32) -> (i32, i32) {
    %c0_i32 = arith.constant 0 : i32
    %c0_i32_0 = arith.constant 0 : i32
    %c0_i32_1 = arith.constant 0 : i32
    return %c0_i32, %c0_i32_0 : i32, i32
  }
}

</mosaic_0001>

<bundles_post_ra>
// kernel: tpu_custom_call.1
= control target key start
LH: loop header
LB: loop body
LE: loop exit
PB: predicated region body
PF: predicated region fallthrough
CT: control target
= control target key end

     0   :  { %8 = vsyncpa [#allocation3], 0  ;;  %s219_s0 = inlined_call_operand.hbm [shape: f32[2,32], index: 0, kind: input, shape index: {}]   ;;  %s220_s1 = inlined_call_operand.hbm [shape: f32[32,128], index: 1, kind: input, shape index: {}]   ;;  %s221_s2 = inlined_call_operand.vmem [shape: f32[1,128], index: 2, kind: input, shape index: {}]   ;;  %s222_s3 = inlined_call_operand.hbm [shape: f32[2,128], index: 3, kind: output, shape index: {}]  }
   0x1   :  { %9 = vsyncpa [#allocation6], 0 }
   0x2   :  { %10 = vsyncpa [#allocation4], 0  ;;  %s16_s14 = sshll.u32 %s219_s0, 4  ;;  %s182_s15 = smov [#allocation2]   ;;  %s17_s14 = int_to_ptr.hbm [resolvable:$true] %s16_s14 }
   0x3   :  { %s18_s16 = sshll.u32 %s182_s15, 4  ;;  %s26_s19 = sshll.u32 %s220_s1, 4  ;;  %s19_s16 = int_to_ptr.vmem [resolvable:$true] %s18_s16  ;;  %s27_s19 = int_to_ptr.hbm [resolvable:$true] %s26_s19 }
   0x4   :  { %21 = dma.hbm_to_vmem [thread:$0]  %s17_s14, 32, %s19_s16, [#allocation3]  }
   0x5   :  { %s183_s20 = smov [#allocation5]   ;;  %s184_s22 = smov 128  }
   0x6   :  { %s28_s21 = sshll.u32 %s183_s20, 4  ;;  %s185_s23 = smov 8   ;;  %s29_s21 = int_to_ptr.vmem [resolvable:$true] %s28_s21 }
   0x7   :  { %34 = dma.hbm_to_vmem [thread:$0]  %s27_s19, 512, %s29_s21, [#allocation6], %s184_s22, %s184_s22, %s185_s23  }
   0x8   :  { %176 = dma.done.wait [#allocation3], 32  }
   0x9   :  { %177 = vsyncadd [#allocation3], 4294967264 }
   0xa   :  { %178 = dma.done.wait [#allocation6], 512  }
   0xb   :  { %179 = vsyncadd [#allocation6], 4294966784  ;;  %v49_v0 = vld [vmem:[#allocation5 + $0x18] sm:$0xff]  ;;  %v48_v1 = vld [vmem:[#allocation5 + $0x10] sm:$0xff]  ;;  %vm54_vm0 = vcmask 261120   ;;  %s186_s24 = smov [#allocation7]  }
   0xc   :  { %70 = vmatpush.msra.mxu0 %v49_v0  ;;  %v47_v2 = vld [vmem:[#allocation5 + $0x8] sm:$0xff]  ;;  %v46_v3 = vld [vmem:[#allocation5] sm:$0xff]  ;;  %v45_v4 = vld [vmem:[#allocation2] sm:$0x3]  ;;  %s84_s25 = sshll.u32 %s186_s24, 4  ;;  %s86_s28 = sshll.u32 %s222_s3, 4  ;;  %s85_s25 = int_to_ptr.vmem [resolvable:$true] %s84_s25  ;;  %s87_s28 = int_to_ptr.hbm [resolvable:$true] %s86_s28 }
   0xd   :  { %v103_v5 = vld [vmem:[%s221_s2] ss:$0 sm:$0xff] }
   0xe   :  { %71 = vmatpush.msra.mxu0 %v48_v1 }
  0x10   :  { %72 = vmatpush.msra.mxu0 %v47_v2 }
  0x12   :  { %73 = vmatpush.msra.mxu0 %v46_v3 }
  0x13   :  { %97 = vmatmul.msk.f32.vlgmr.msra.gmra.mxu0 %vm54_vm0, %v45_v4 }
  0x90   :  { %v75_v6 = vpop.f32.mrf.mxu0 }
  0x91   :  { %v76_v7 = vadd.f32 %v103_v5, %v75_v6 }
  0x93   :  { %78 = vst [vmem:[#allocation7] sm:$0x3] %v76_v7 }
  0x94   :  { %89 = dma.vmem_to_hbm [thread:$0]  %s85_s25, 32, %s87_s28, [#allocation4]  }
  0x95   :  { %180 = dma.done.wait [#allocation4], 32  }
  0x96   :  { %181 = vsyncadd [#allocation4], 4294967264 }
  0x97   :  { %94 = vsyncpa [#allocation3], 1 }
  0x98   :  { %95 = vsyncpa [#allocation6], 1 }
  0x99   :  { %96 = vsyncpa [#allocation4], 1 }

</bundles_post_ra>
